<compile_context>
chip_gen: v5e
topology: v5e:2x2
jax: 0.10.0
libtpu: 0.0.40
codegen_flags: <defaults>
</compile_context>

<pallas_src>
import functools

import jax
import jax.numpy as jnp
from jax.experimental import pallas as pl
from jax.experimental.pallas import tpu as pltpu


def fuse_scores(enr, tst, cm, w_row, bias, *, map_function="sigmoid"):
    """Pure-jnp epilogue math (fusable into an upstream kernel).

    enr, tst : (N, D_ASV) f32
    cm       : (N, 160)   f32
    w_row    : (1, 160)   f32   (fc_cm weight, NOT transposed)
    bias     : scalar     f32
    returns  : (N, 1)     f32
    """
    # --- SV branch: cosine similarity along feature dim, eps = 1e-8 ---
    # Matches recent PyTorch (>=1.12):  dot / (max(||a||,eps) * max(||b||,eps))
    #                                 = dot * rsqrt(max(sa,eps^2)) * rsqrt(max(sb,eps^2))
    dot = jnp.sum(enr * tst, axis=1, keepdims=True)              # (N, 1)
    s_enr = jnp.sum(enr * enr, axis=1, keepdims=True)            # (N, 1)
    s_tst = jnp.sum(tst * tst, axis=1, keepdims=True)            # (N, 1)
    eps2 = jnp.float32(1e-16)                                    # (1e-8)^2
    inv_norms = (jax.lax.rsqrt(jnp.maximum(s_enr, eps2)) *       # EUP rsqrt
                 jax.lax.rsqrt(jnp.maximum(s_tst, eps2)))
    cos = dot * inv_norms
    if map_function == "sigmoid":
        p_sv = jax.nn.sigmoid(cos)
    elif map_function == "linear":
        p_sv = (cos + 1.0) * 0.5                                 # cos2prob_lin
    else:
        raise ValueError("which function to calculate probability")

    # --- CM branch: Linear(160 -> 1) as VPU mul + XLU lane reduce (no MXU) ---
    cm_score = jnp.sum(cm * w_row, axis=1, keepdims=True) + bias  # (N, 1)
    p_cm = jax.nn.sigmoid(cm_score)

    return p_sv + p_cm


def _combine_kernel(enr_ref, tst_ref, cm_ref, w_ref, b_ref, o_ref, *, map_function):
    """enr_ref/tst_ref : (TB, D_ASV) f32 VMEM
       cm_ref          : (TB, 160)   f32 VMEM
       w_ref           : (1, 160)    f32 VMEM
       b_ref           : (1,)        f32 SMEM (scalar read)
       o_ref           : (TB, 1)     f32 VMEM
    """
    o_ref[...] = fuse_scores(
        enr_ref[...], tst_ref[...], cm_ref[...], w_ref[...], b_ref[0],
        map_function=map_function,
    ).astype(o_ref.dtype)


def baseline1_improved_forward(embd_asv_enr, embd_asv_tst, embd_cm_tst,
                               fc_cm_weight, fc_cm_bias, *,
                               map_function="sigmoid", row_tile=1024):
    """fc_cm_weight: (1, 160) as in nn.Linear(160, 1); fc_cm_bias: scalar."""
    B, d_asv = embd_asv_enr.shape
    assert embd_asv_tst.shape == (B, d_asv)
    Bc, d_cm = embd_cm_tst.shape
    assert Bc == B and d_cm == 160

    w = jnp.asarray(fc_cm_weight, jnp.float32).reshape(1, d_cm)   # (1, 160) VMEM
    b = jnp.asarray(fc_cm_bias, jnp.float32).reshape(1,)          # (1,)     SMEM

    kernel = functools.partial(_combine_kernel, map_function=map_function)
    out_shape = jax.ShapeDtypeStruct((B, 1), jnp.float32)

    vmem = pl.BlockSpec(memory_space=pltpu.MemorySpace.VMEM)
    smem = pl.BlockSpec(memory_space=pltpu.MemorySpace.SMEM)

    if B <= row_tile:
        # Tiny / overhead-bound case: gridless single block, no pipelining.
        return pl.pallas_call(
            kernel,
            out_shape=out_shape,
            in_specs=[vmem, vmem, vmem, vmem, smem],
            out_specs=vmem,
        )(embd_asv_enr, embd_asv_tst, embd_cm_tst, w, b)

    # Large-batch path: 1-D grid over row tiles.  ~2.2 MB of f32 inputs per
    # 1024-row tile (x2 for double buffering ~= 4.4 MB live), well inside every
    # generation's scoped-VMEM default, so no vmem_limit_bytes override.
    tb = row_tile
    grid = (pl.cdiv(B, tb),)
    return pl.pallas_call(
        kernel,
        out_shape=out_shape,
        grid=grid,
        in_specs=[
            pl.BlockSpec((tb, d_asv), lambda i: (i, 0)),
            pl.BlockSpec((tb, d_asv), lambda i: (i, 0)),
            pl.BlockSpec((tb, d_cm), lambda i: (i, 0)),
            pl.BlockSpec((1, d_cm), lambda i: (0, 0)),   # weight resident
            smem,                                        # bias, whole (1,) array
        ],
        out_specs=pl.BlockSpec((tb, 1), lambda i: (i, 0)),
        compiler_params=pltpu.CompilerParams(
            dimension_semantics=("parallel",)),          # v7x: 2 TCs split batch
    )(embd_asv_enr, embd_asv_tst, embd_cm_tst, w, b)


def _reference(enr, tst, cm, w, b):
    """Pure-JAX reference mirroring the PyTorch forward (per-norm eps clamp)."""
    eps = 1e-8
    dot = jnp.sum(enr * tst, axis=1, keepdims=True)
    n_enr = jnp.maximum(jnp.linalg.norm(enr, axis=1, keepdims=True), eps)
    n_tst = jnp.maximum(jnp.linalg.norm(tst, axis=1, keepdims=True), eps)
    p_sv = jax.nn.sigmoid(dot / (n_enr * n_tst))
    p_cm = jax.nn.sigmoid(cm @ w.reshape(1, -1).T + b)
    return p_sv + p_cm


if __name__ == "__main__":
    key = jax.random.PRNGKey(0)
    k1, k2, k3, k4, k5, k6, k7, k8 = jax.random.split(key, 8)

    D_ASV = 192    # ASV (speaker) embedding dim
    D_CM = 160     # AASIST CM embedding dim (fixed by fc_cm = Linear(160, 1))

    # Deterministic stand-in for AASIST out_layer.weight[1] / bias[1]
    fc_cm_weight = 0.05 * jax.random.normal(k4, (1, D_CM), dtype=jnp.float32)
    fc_cm_bias = 0.05 * jax.random.normal(k5, (), dtype=jnp.float32)

    # --- small batch: gridless single-block path (matches the module's use) ---
    B = 8
    embd_asv_enr = jax.random.normal(k1, (B, D_ASV), dtype=jnp.float32)
    embd_asv_tst = jax.random.normal(k2, (B, D_ASV), dtype=jnp.float32)
    embd_cm_tst = jax.random.normal(k3, (B, D_CM), dtype=jnp.float32)

    out = baseline1_improved_forward(embd_asv_enr, embd_asv_tst, embd_cm_tst,
                                     fc_cm_weight, fc_cm_bias)
    out = jax.block_until_ready(out)
    ref = _reference(embd_asv_enr, embd_asv_tst, embd_cm_tst,
                     fc_cm_weight, fc_cm_bias)
    assert out.shape == (B, 1)
    assert jnp.allclose(out, ref, atol=2e-5, rtol=2e-5), (out, ref)

    # --- large batch: tiled "parallel" row grid (1024-row tiles) ---
    BL = 4096
    enr_l = jax.random.normal(k6, (BL, D_ASV), dtype=jnp.float32)
    tst_l = jax.random.normal(k7, (BL, D_ASV), dtype=jnp.float32)
    cm_l = jax.random.normal(k8, (BL, D_CM), dtype=jnp.float32)

    out_l = baseline1_improved_forward(enr_l, tst_l, cm_l,
                                       fc_cm_weight, fc_cm_bias, row_tile=1024)
    out_l = jax.block_until_ready(out_l)
    ref_l = _reference(enr_l, tst_l, cm_l, fc_cm_weight, fc_cm_bias)
    assert out_l.shape == (BL, 1)
    assert jnp.allclose(out_l, ref_l, atol=2e-5, rtol=2e-5)

    print("KERNEL_OK")
</pallas_src>

<mosaic_0001>
module attributes {stable_mosaic.version = 11 : i64} {
  func.func @_combine_kernel(%arg0: memref<8x192xf32, #tpu.memory_space<vmem>>, %arg1: memref<8x192xf32, #tpu.memory_space<vmem>>, %arg2: memref<8x160xf32, #tpu.memory_space<vmem>>, %arg3: memref<1x160xf32, #tpu.memory_space<vmem>>, %arg4: memref<1xf32, #tpu.memory_space<smem>>, %arg5: memref<8x1xf32, #tpu.memory_space<vmem>>) attributes {dimension_semantics = [], scalar_prefetch = 0 : i64, scratch_operands = 0 : i64, tpu.core_type = #tpu.core_type<tc>} {
    %c0 = arith.constant 0 : index
    %c0_0 = arith.constant 0 : index
    %0 = vector.load %arg0[%c0, %c0_0] : memref<8x192xf32, #tpu.memory_space<vmem>>, vector<8x192xf32>
    %c0_1 = arith.constant 0 : index
    %c0_2 = arith.constant 0 : index
    %1 = vector.load %arg1[%c0_1, %c0_2] : memref<8x192xf32, #tpu.memory_space<vmem>>, vector<8x192xf32>
    %c0_3 = arith.constant 0 : index
    %c0_4 = arith.constant 0 : index
    %2 = vector.load %arg2[%c0_3, %c0_4] : memref<8x160xf32, #tpu.memory_space<vmem>>, vector<8x160xf32>
    %c0_5 = arith.constant 0 : index
    %c0_6 = arith.constant 0 : index
    %3 = vector.load %arg3[%c0_5, %c0_6] : memref<1x160xf32, #tpu.memory_space<vmem>>, vector<1x160xf32>
    %c0_7 = arith.constant 0 : index
    %4 = memref.load %arg4[%c0_7] : memref<1xf32, #tpu.memory_space<smem>>
    %5 = arith.mulf %0, %1 : vector<8x192xf32>
    %cst = arith.constant dense<0.000000e+00> : vector<8xf32>
    %6 = vector.multi_reduction <add>, %5, %cst [1] : vector<8x192xf32> to vector<8xf32>
    %7 = vector.shape_cast %6 : vector<8xf32> to vector<8x1xf32>
    %8 = arith.mulf %0, %0 : vector<8x192xf32>
    %cst_8 = arith.constant dense<0.000000e+00> : vector<8xf32>
    %9 = vector.multi_reduction <add>, %8, %cst_8 [1] : vector<8x192xf32> to vector<8xf32>
    %10 = vector.shape_cast %9 : vector<8xf32> to vector<8x1xf32>
    %11 = arith.mulf %1, %1 : vector<8x192xf32>
    %cst_9 = arith.constant dense<0.000000e+00> : vector<8xf32>
    %12 = vector.multi_reduction <add>, %11, %cst_9 [1] : vector<8x192xf32> to vector<8xf32>
    %13 = vector.shape_cast %12 : vector<8xf32> to vector<8x1xf32>
    %cst_10 = arith.constant 1.000000e-16 : f32
    %14 = vector.broadcast %cst_10 : f32 to vector<8x1xf32>
    %15 = arith.maximumf %10, %14 : vector<8x1xf32>
    %16 = math.rsqrt %15 : vector<8x1xf32>
    %cst_11 = arith.constant 1.000000e-16 : f32
    %17 = vector.broadcast %cst_11 : f32 to vector<8x1xf32>
    %18 = arith.maximumf %13, %17 : vector<8x1xf32>
    %19 = math.rsqrt %18 : vector<8x1xf32>
    %20 = arith.mulf %16, %19 : vector<8x1xf32>
    %21 = arith.mulf %7, %20 : vector<8x1xf32>
    %22 = arith.negf %21 : vector<8x1xf32>
    %23 = math.exp %22 : vector<8x1xf32>
    %cst_12 = arith.constant 1.000000e+00 : f32
    %24 = vector.broadcast %cst_12 : f32 to vector<8x1xf32>
    %25 = arith.addf %24, %23 : vector<8x1xf32>
    %26 = arith.divf %24, %25 : vector<8x1xf32>
    %27 = vector.broadcast %3 : vector<1x160xf32> to vector<8x160xf32>
    %28 = arith.mulf %2, %27 : vector<8x160xf32>
    %cst_13 = arith.constant dense<0.000000e+00> : vector<8xf32>
    %29 = vector.multi_reduction <add>, %28, %cst_13 [1] : vector<8x160xf32> to vector<8xf32>
    %30 = vector.shape_cast %29 : vector<8xf32> to vector<8x1xf32>
    %31 = vector.broadcast %4 : f32 to vector<8x1xf32>
    %32 = arith.addf %30, %31 : vector<8x1xf32>
    %33 = arith.negf %32 : vector<8x1xf32>
    %34 = math.exp %33 : vector<8x1xf32>
    %cst_14 = arith.constant 1.000000e+00 : f32
    %35 = vector.broadcast %cst_14 : f32 to vector<8x1xf32>
    %36 = arith.addf %35, %34 : vector<8x1xf32>
    %37 = arith.divf %35, %36 : vector<8x1xf32>
    %38 = arith.addf %26, %37 : vector<8x1xf32>
    %c0_15 = arith.constant 0 : index
    %c0_16 = arith.constant 0 : index
    %39 = vector.load %arg5[%c0_15, %c0_16] : memref<8x1xf32, #tpu.memory_space<vmem>>, vector<8x1xf32>
    tpu.vector_store %arg5[%c0_15, %c0_16], %38 {strides = array<i32>} : memref<8x1xf32, #tpu.memory_space<vmem>>, vector<8x1xf32>,
    return
  }
}

</mosaic_0001>

<bundles_post_ra>
// kernel: tpu_custom_call.1
= control target key start
LH: loop header
LB: loop body
LE: loop exit
PB: predicated region body
PF: predicated region fallthrough
CT: control target
= control target key end

     0   :  { %11 = vsyncpa [#allocation4], 0  ;;  %s327_s0 = inlined_call_operand.hbm [shape: f32[8,192], index: 0, kind: input, shape index: {}]   ;;  %s328_s1 = inlined_call_operand.hbm [shape: f32[8,192], index: 1, kind: input, shape index: {}]   ;;  %s329_s2 = inlined_call_operand.hbm [shape: f32[8,160], index: 2, kind: input, shape index: {}]   ;;  %s330_s3 = inlined_call_operand.vmem [shape: f32[1,160], index: 3, kind: input, shape index: {}]   ;;  %s331_s4 = inlined_call_operand.<no memory space> [shape: f32[1], index: 4, kind: input, shape index: {}]   ;;  %s332_s5 = inlined_call_operand.vmem [shape: f32[8,1], index: 5, kind: output, shape index: {}]  }
   0x1   :  { %12 = vsyncpa [#allocation6], 0  ;;  %s29_s20 = sshll.u32 %s328_s1, 4  ;;  %s267_s21 = smov [#allocation5]   ;;  %s30_s20 = int_to_ptr.hbm [resolvable:$true] %s29_s20 }
   0x2   :  { %s31_s22 = sshll.u32 %s267_s21, 4  ;;  %s18_s25 = sshll.u32 %s327_s0, 4  ;;  %s32_s22 = int_to_ptr.vmem [resolvable:$true] %s31_s22  ;;  %s19_s25 = int_to_ptr.hbm [resolvable:$true] %s18_s25 }
   0x3   :  { %34 = dma.hbm_to_vmem [thread:$0]  %s30_s20, 256, %s32_s22, [#allocation6]  }
   0x4   :  { %s268_s26 = smov [#allocation3]   ;;  %s40_s30 = sshll.u32 %s329_s2, 4  ;;  %s41_s30 = int_to_ptr.hbm [resolvable:$true] %s40_s30 }
   0x5   :  { %s20_s27 = sshll.u32 %s268_s26, 4  ;;  %s269_s1 = smov [#allocation7]   ;;  %s21_s27 = int_to_ptr.vmem [resolvable:$true] %s20_s27 }
   0x6   :  { %23 = dma.hbm_to_vmem [thread:$0]  %s19_s25, 256, %s21_s27, [#allocation4]  }
   0x7   :  { %s42_s6 = sshll.u32 %s269_s1, 4  ;;  %s43_s6 = int_to_ptr.vmem [resolvable:$true] %s42_s6 }
   0x8   :  { %45 = dma.hbm_to_vmem [thread:$0]  %s41_s30, 256, %s43_s6, [#allocation6]  }
   0x9   :  { %263 = dma.done.wait [#allocation4], 256  }
   0xa   :  { %264 = vsyncadd [#allocation4], 4294967040 }
   0xb   :  { %265 = dma.done.wait [#allocation6], 512  }
   0xc   :  { %266 = vsyncadd [#allocation6], 4294966784  ;;  %v62_v0 = vld [vmem:[#allocation3] sm:$0xff]  ;;  %v63_v1 = vld [vmem:[#allocation3 + $0x8] sm:$0xff]  ;;  %vm72_vm0 = vcmask 523264   ;;  %vm139_vm1 = vcmask 261120   ;;  %v144_v29 = vstv %s331_s4 }
   0xd   :  { %v64_v2 = vld [vmem:[#allocation5] sm:$0xff]  ;;  %v77_v3 = vmul.f32 %v62_v0, %v62_v0  ;;  %v78_v4 = vmul.f32 %v63_v1, %v63_v1  ;;  %v65_v5 = vld [vmem:[#allocation5 + $0x8] sm:$0xff]  ;;  %v67_v8 = vld [vmem:[#allocation7 + $0x8] sm:$0xff] }
   0xe   :  { %v70_v6 = vmul.f32 %v64_v2, %v62_v0  ;;  %v71_v7 = vmul.f32 %v65_v5, %v63_v1  ;;  %v68_v9 = vld [vmem:[%s330_s3] sm:$0x3]  ;;  %v84_v11 = vmul.f32 %v65_v5, %v65_v5  ;;  %v83_v19 = vmul.f32 %v64_v2, %v64_v2 }
   0xf   :  { %v79_v10 = vsel %vm72_vm0, %v78_v4, 0.0  ;;  %v133_v12 = vperm.slane %v68_v9, 0  ;;  %v134_v13 = vperm.slane %v68_v9, 1  ;;  %v66_v16 = vld [vmem:[#allocation7] sm:$0xff] }
  0x10   :  { %v80_v14 = vadd.f32 %v79_v10, %v77_v3  ;;  %v73_v15 = vsel %vm72_vm0, %v71_v7, 0.0  ;;  %v85_v20 = vsel %vm72_vm0, %v84_v11, 0.0  ;;  %vm166_vm0 = vcmask 7168  }
  0x11   :  { %v74_v17 = vadd.f32 %v73_v15, %v70_v6  ;;  %v138_v18 = vmul.f32 %v134_v13, %v67_v8  ;;  %v137_v21 = vmul.f32 %v133_v12, %v66_v16  ;;  %v86_v23 = vadd.f32 %v85_v20, %v83_v19 }
  0x12   :  { %81 = vadd.xlane.f32.xlu0 %v80_v14 }
  0x13   :  { %75 = vadd.xlane.f32.xlu1 %v74_v17  ;;  %v140_v22 = vsel %vm139_vm1, %v138_v18, 0.0 }
  0x14   :  { %v141_v24 = vadd.f32 %v140_v22, %v137_v21 }
  0x1a   :  { %87 = vadd.xlane.f32.xlu0 %v86_v23 }
  0x1b   :  { %142 = vadd.xlane.f32.xlu1 %v141_v24 }
  0x85   :  { %v82_v25 = vpop.xlane.xlu0 %81 }
  0x86   :  { %v89_v26 = vmax.f32 %v82_v25, 1e-16  ;;  %v76_v27 = vpop.xlane.xlu1 %75 }
  0x88   :  { %179 = vrsqrt.f32 %v89_v26  ;;  %vm96_vm4 = vweird.f32 %v89_v26 }
  0x8d   :  { %v88_v28 = vpop.xlane.xlu0 %87 }
  0x8e   :  { %v180_v30 = vpop.eup %179  ;;  %v100_v31 = vmax.f32 %v88_v28, 1e-16  ;;  %v143_v32 = vpop.xlane.xlu1 %142 }
  0x8f   :  { %v91_v33 = vmul.f32 %v180_v30, %v89_v26  ;;  %v145_v34 = vadd.f32 %v144_v29, %v143_v32  ;;  %vm97_vm2 = vweird.f32 %v180_v30 }
  0x90   :  { %181 = vrsqrt.f32 %v100_v31  ;;  %vm107_vm5 = vweird.f32 %v100_v31  ;;  %vm98_vm6 = vmor %vm96_vm4, %vm97_vm2 }
  0x91   :  { %v92_v35 = vmul.f32 %v180_v30, %v91_v33  ;;  %v175_v36 = vmul.f32 -1.442695, %v145_v34 }
  0x93   :  { %v93_v37 = vmul.f32 0.5, %v92_v35  ;;  %183 = vpow2.f32 %v175_v36 }
  0x95   :  { %v94_v40 = vsub.f32 1.5, %v93_v37 }
  0x96   :  { %v182_v38 = vpop.eup %181 }
  0x97   :  { %v102_v39 = vmul.f32 %v182_v38, %v100_v31  ;;  %vm108_vm3 = vweird.f32 %v182_v38  ;;  %v95_v44 = vmul.f32 %v180_v30, %v94_v40 }
  0x98   :  { %vm109_vm7 = vmor %vm107_vm5, %vm108_vm3 }
  0x99   :  { %v103_v41 = vmul.f32 %v182_v38, %v102_v39  ;;  %v184_v45 = vpop.eup %183  ;;  %v99_v47 = vsel %vm98_vm6, %v180_v30, %v95_v44 }
  0x9a   :  { %v149_v49 = vadd.f32 1.0, %v184_v45 }
  0x9b   :  { %v104_v42 = vmul.f32 0.5, %v103_v41 }
  0x9c   :  { %185 = vrcp.f32 %v149_v49  ;;  %vm155_vm8 = vweird.f32 %v149_v49  ;;  %v161_v61 = vand.u32 2147483648, %v149_v49  ;;  %v159_v0 = vand.u32 2147483647, %v149_v49 }
  0x9d   :  { %v105_v43 = vsub.f32 1.5, %v104_v42 }
  0x9e   :  { %v162_v5 = vor.u32 1.1754944e-38, %v161_v61  ;;  %vm160_vm13 = vcmp.eq.f32.partialorder %v159_v0, 8.507059e+37 }
  0x9f   :  { %v106_v46 = vmul.f32 %v182_v38, %v105_v43 }
  0xa1   :  { %v110_v48 = vsel %vm109_vm7, %v182_v38, %v106_v46 }
  0xa2   :  { %v111_v50 = vmul.f32 %v110_v48, %v99_v47  ;;  %v186_v53 = vpop.eup %185 }
  0xa3   :  { %v151_v55 = vmul.f32 %v186_v53, %v149_v49  ;;  %vm156_vm9 = vweird.f32 %v186_v53 }
  0xa4   :  { %v112_v51 = vmul.f32 %v111_v50, %v76_v27  ;;  %vm318_vm10 = vmor %vm155_vm8, %vm156_vm9 }
  0xa5   :  { %v152_v57 = vsub.f32 1.0, %v151_v55 }
  0xa6   :  { %v174_v52 = vmul.f32 -1.442695, %v112_v51 }
  0xa7   :  { %v153_v58 = vmul.f32 %v186_v53, %v152_v57 }
  0xa8   :  { %187 = vpow2.f32 %v174_v52 }
  0xa9   :  { %v154_v63 = vadd.f32 %v186_v53, %v153_v58 }
  0xab   :  { %v158_v7 = vsel %vm318_vm10, %v186_v53, %v154_v63 }
  0xac   :  { %v163_v11 = vsel %vm160_vm13, %v162_v5, %v158_v7 }
  0xae   :  { %v188_v54 = vpop.eup %187 }
  0xaf   :  { %v116_v56 = vadd.f32 1.0, %v188_v54 }
  0xb1   :  { %189 = vrcp.f32 %v116_v56  ;;  %v128_v1 = vand.u32 2147483648, %v116_v56  ;;  %v126_v4 = vand.u32 2147483647, %v116_v56  ;;  %vm122_vm12 = vweird.f32 %v116_v56 }
  0xb3   :  { %v129_v8 = vor.u32 1.1754944e-38, %v128_v1  ;;  %vm127_vm15 = vcmp.eq.f32.partialorder %v126_v4, 8.507059e+37 }
  0xb7   :  { %v190_v59 = vpop.eup %189 }
  0xb8   :  { %v118_v60 = vmul.f32 %v190_v59, %v116_v56  ;;  %vm123_vm11 = vweird.f32 %v190_v59 }
  0xb9   :  { %vm124_vm14 = vmor %vm122_vm12, %vm123_vm11 }
  0xba   :  { %v119_v62 = vsub.f32 1.0, %v118_v60 }
  0xbc   :  { %v120_v3 = vmul.f32 %v190_v59, %v119_v62 }
  0xbe   :  { %v121_v6 = vadd.f32 %v190_v59, %v120_v3 }
  0xc0   :  { %v125_v9 = vsel %vm124_vm14, %v190_v59, %v121_v6 }
  0xc1   :  { %v130_v10 = vsel %vm127_vm15, %v129_v8, %v125_v9 }
  0xc2   :  { %v165_v12 = vadd.f32 %v163_v11, %v130_v10 }
  0xc4   :  { %167 = vst.msk [vmem:[%s332_s5] sm:$0xff] %vm166_vm0, %v165_v12 }
  0xc5   :  { %172 = vsyncpa [#allocation4], 1 }
  0xc6   :  { %173 = vsyncpa [#allocation6], 1 }

</bundles_post_ra>
